<compile_context>
chip_gen: v6e
topology: v6e:2x2x1
jax: 0.10.0
libtpu: 0.0.40
codegen_flags: <defaults>
</compile_context>

<pallas_src>
import functools

import jax
import jax.numpy as jnp
from jax.experimental import pallas as pl
from jax.experimental.pallas import tpu as pltpu


def _round_up(x, m):
    return ((x + m - 1) // m) * m


def _largest_divisor(n, candidates):
    for c in candidates:
        if n % c == 0:
            return c
    return candidates[-1]


# ---------------------------------------------------------------------------
# Kernels
# ---------------------------------------------------------------------------

def _fc_relu_single_kernel(x_ref, w_ref, b_ref, o_ref):
    """Whole problem in VMEM: out = relu(x @ w + b) in one shot (no grid)."""
    x_b = x_ref[...].astype(jnp.bfloat16)          # cast in-kernel (VPU is free)
    y = jnp.dot(x_b, w_ref[...], preferred_element_type=jnp.float32)
    o_ref[...] = jnp.maximum(y + b_ref[...], 0.0).astype(o_ref.dtype)


def _fc_relu_tiled_kernel(x_ref, w_ref, b_ref, o_ref):
    """(M, N, K)-tiled path: accumulate into the resident f32 output block."""
    k = pl.program_id(2)

    @pl.when(k == 0)
    def _():
        o_ref[...] = jnp.zeros_like(o_ref)

    x_b = x_ref[...].astype(jnp.bfloat16)          # per-tile f32 -> bf16 cast
    o_ref[...] += jnp.dot(x_b, w_ref[...], preferred_element_type=jnp.float32)

    @pl.when(k == pl.num_programs(2) - 1)
    def _():
        o_ref[...] = jnp.maximum(o_ref[...] + b_ref[...], 0.0)


# ---------------------------------------------------------------------------
# Param prep (one time, outside the forward)
# ---------------------------------------------------------------------------

def prepare_fc_params(weight, bias, lane_multiple=256, k_multiple=128):
    """One-time prep of nn.Linear params for the kernel.

    weight: (out_features, in_features)  -- PyTorch nn.Linear convention
    bias:   (out_features,)
    Returns (w_kn, bias_row):
      w_kn     : (Kp, Np) bfloat16, transposed, K zero-padded to a multiple of
                 `k_multiple`, N zero-padded to a multiple of `lane_multiple`
                 (256 -> fills 256-wide MXU on v6e/v7x, lane-dense stores).
      bias_row : (1, Np) float32.
    All padding happens here so the forward never rewrites the weight in HBM.
    """
    out_features, in_features = weight.shape
    n_pad = _round_up(out_features, lane_multiple)
    k_pad = _round_up(in_features, k_multiple)
    w_kn = jnp.zeros((k_pad, n_pad), jnp.bfloat16)
    w_kn = w_kn.at[:in_features, :out_features].set(weight.T.astype(jnp.bfloat16))
    bias_row = jnp.zeros((1, n_pad), jnp.float32)
    bias_row = bias_row.at[:, :out_features].set(bias.astype(jnp.float32))
    return w_kn, bias_row


# ---------------------------------------------------------------------------
# Forward wrappers
# ---------------------------------------------------------------------------

# Single-shot (no grid) path: operand+result bytes threshold and VMEM limit
# are sized to be safe on v7x (64 MiB physical VMEM); v5e/v6e have headroom.
_SINGLE_SHOT_BYTES = 44 * 1024 * 1024
_SINGLE_SHOT_VMEM_LIMIT = 56 * 1024 * 1024
_TILED_VMEM_CAP = 48 * 1024 * 1024


def _fc_relu_tiled(x, w_kn, bias_row, B, Kp, Np):
    """Scalable path: (M, N, K) grid, M/N parallel, K reduction last (arbitrary)."""
    # --- M tile: tiny batches use one 8-aligned tile; otherwise pick the tile
    # in {128, 256} that minimizes padded-row waste (tie -> larger tile).
    mp8 = _round_up(B, 8)
    if mp8 <= 128:
        tm = mp8
    else:
        waste128 = _round_up(B, 128) - B
        waste256 = _round_up(B, 256) - B
        tm = 128 if waste128 < waste256 else 256
    Mp = _round_up(B, tm)

    # --- N tile: lane-dense, >=256 whenever Np allows (v6e/v7x MXU width).
    tn = _largest_divisor(Np, (512, 256, 128))
    # --- K tile: large, so per-step DMA dwarfs the ~0.35us grid-step overhead.
    tk = _largest_divisor(Kp, (2048, 1024, 512, 256, 128))

    # Keep v7x's second TensorCore busy: ensure at least one "parallel" axis
    # has >= 2 iterations when the M and N grids would both collapse to 1.
    if Mp // tm == 1 and Np // tn == 1 and Np >= 256:
        tn = Np // 2

    if Mp != B:
        x = jnp.zeros((Mp, Kp), x.dtype).at[:B, :].set(x)

    grid = (Mp // tm, Np // tn, Kp // tk)

    # Double-buffered x (f32) / w (bf16) / bias blocks + double-buffered f32
    # output block, with headroom; capped for v7x's 64 MiB VMEM.
    vmem_bytes = 2 * (tm * tk * 4 + tk * tn * 2 + tn * 4) + 2 * (tm * tn * 4)
    vmem_limit = min(max(int(vmem_bytes * 1.5), 16 * 1024 * 1024), _TILED_VMEM_CAP)

    return pl.pallas_call(
        _fc_relu_tiled_kernel,
        out_shape=jax.ShapeDtypeStruct((Mp, Np), jnp.float32),
        grid_spec=pl.GridSpec(
            grid=grid,
            in_specs=[
                pl.BlockSpec((tm, tk), lambda i, j, k: (i, k)),   # x tile (f32)
                pl.BlockSpec((tk, tn), lambda i, j, k: (k, j)),   # w tile (bf16)
                pl.BlockSpec((1, tn), lambda i, j, k: (0, j)),    # bias row
            ],
            out_specs=pl.BlockSpec((tm, tn), lambda i, j, k: (i, j)),
        ),
        compiler_params=pltpu.CompilerParams(
            dimension_semantics=("parallel", "parallel", "arbitrary"),
            vmem_limit_bytes=vmem_limit,
        ),
    )(x, w_kn, bias_row)


@functools.partial(jax.jit, static_argnames=("out_features", "force_tiled"))
def fc_block_forward(x, w_kn, bias_row, out_features, force_tiled=False):
    """FcBlock forward: flatten -> Linear -> ReLU -> Dropout (eval = identity).

    x:        (B, C, H, W) or (B, K) float32
    w_kn:     (Kp, Np) bfloat16  -- from prepare_fc_params (transposed, padded)
    bias_row: (1, Np) float32

    Note: the matmul runs in bf16 with f32 accumulation, so results deviate
    slightly from PyTorch's f32 Linear (validated below against both refs).
    """
    if x.ndim > 2:
        x = x.reshape(x.shape[0], -1)     # Flatten, row-major == torch.flatten
    B, K = x.shape
    Kp, Np = w_kn.shape
    assert K <= Kp and Np % 128 == 0 and out_features <= Np

    if K != Kp:  # rare: in_features not a multiple of 128 (weight K pre-padded)
        x = jnp.zeros((B, Kp), x.dtype).at[:, :K].set(x)

    # x stays f32; the kernels cast each tile to bf16 on-chip before the dot.
    operand_bytes = B * Kp * 4 + Kp * Np * 2 + Np * 4 + B * Np * 4
    if force_tiled or operand_bytes > _SINGLE_SHOT_BYTES:
        out_p = _fc_relu_tiled(x, w_kn, bias_row, B, Kp, Np)
    else:
        out_p = pl.pallas_call(
            _fc_relu_single_kernel,
            out_shape=jax.ShapeDtypeStruct((B, Np), jnp.float32),
            in_specs=[
                pl.BlockSpec(memory_space=pltpu.MemorySpace.VMEM),
                pl.BlockSpec(memory_space=pltpu.MemorySpace.VMEM),
                pl.BlockSpec(memory_space=pltpu.MemorySpace.VMEM),
            ],
            out_specs=pl.BlockSpec(memory_space=pltpu.MemorySpace.VMEM),
            compiler_params=pltpu.CompilerParams(
                vmem_limit_bytes=_SINGLE_SHOT_VMEM_LIMIT,
            ),
        )(x, w_kn, bias_row)

    # Dropout(0.5) in eval mode is identity; slice off M/N padding.
    return out_p[:B, :out_features]


def init_fc_params(key, in_features, out_features):
    """Deterministic init mimicking nn.Linear defaults (uniform +-1/sqrt(fan_in))."""
    kw, kb = jax.random.split(key)
    bound = 1.0 / jnp.sqrt(in_features)
    weight = jax.random.uniform(
        kw, (out_features, in_features), jnp.float32, -bound, bound
    )
    bias = jax.random.uniform(kb, (out_features,), jnp.float32, -bound, bound)
    return weight, bias


if __name__ == "__main__":
    key = jax.random.PRNGKey(0)
    kx, kp = jax.random.split(key)

    # Small shapes consistent with FcBlock(flatten=True):
    #   batch=2, channels=4, spatial=16x16 -> input_size = 4*16*16 = 1024
    #   output_size = 32
    B, C, H, W = 2, 4, 16, 16
    in_features = C * H * W
    out_features = 32

    x = jax.random.normal(kx, (B, C, H, W), jnp.float32)
    weight, bias = init_fc_params(kp, in_features, out_features)

    # One-time param prep: transpose + K/N padding + bf16 cast.
    w_kn, bias_row = prepare_fc_params(weight, bias)

    # Single-shot (small-shape) path.
    out = fc_block_forward(x, w_kn, bias_row, out_features)
    out = jax.block_until_ready(out)
    assert out.shape == (B, out_features)

    # References.
    x_flat = x.reshape(B, -1)
    ref_f32 = jnp.maximum(x_flat @ weight.T + bias, 0.0)
    ref_bf16 = jnp.maximum(
        x_flat.astype(jnp.bfloat16).astype(jnp.float32)
        @ weight.T.astype(jnp.bfloat16).astype(jnp.float32)
        + bias,
        0.0,
    )

    assert jnp.allclose(out, ref_bf16, atol=1e-3, rtol=1e-3), "mismatch vs bf16 ref"
    assert jnp.allclose(out, ref_f32, atol=5e-2, rtol=5e-2), "mismatch vs f32 ref"

    # Also exercise the scalable (M, N, K)-tiled path on the same problem.
    out_tiled = fc_block_forward(x, w_kn, bias_row, out_features, force_tiled=True)
    out_tiled = jax.block_until_ready(out_tiled)
    assert out_tiled.shape == (B, out_features)
    assert jnp.allclose(out_tiled, ref_bf16, atol=1e-3, rtol=1e-3), "tiled mismatch"

    print("KERNEL_OK")
</pallas_src>

<mosaic_0001>
module attributes {stable_mosaic.version = 11 : i64} {
  func.func @_fc_relu_single_kernel(%arg0: memref<2x1024xf32, #tpu.memory_space<vmem>>, %arg1: memref<1024x256xbf16, #tpu.memory_space<vmem>>, %arg2: memref<1x256xf32, #tpu.memory_space<vmem>>, %arg3: memref<2x256xf32, #tpu.memory_space<vmem>>) attributes {dimension_semantics = [], scalar_prefetch = 0 : i64, scratch_operands = 0 : i64, tpu.core_type = #tpu.core_type<tc>} {
    %c0 = arith.constant 0 : index
    %c0_0 = arith.constant 0 : index
    %0 = vector.load %arg0[%c0, %c0_0] : memref<2x1024xf32, #tpu.memory_space<vmem>>, vector<2x1024xf32>
    %1 = arith.truncf %0 : vector<2x1024xf32> to vector<2x1024xbf16>
    %c0_1 = arith.constant 0 : index
    %c0_2 = arith.constant 0 : index
    %2 = vector.load %arg1[%c0_1, %c0_2] : memref<1024x256xbf16, #tpu.memory_space<vmem>>, vector<1024x256xbf16>
    %cst = arith.constant dense<0.000000e+00> : vector<2x256xf32>
    %3 = tpu.matmul %1, %2, %cst {dimension_numbers = #tpu.dot_dimension_numbers<[1], [0], [0], [1], [0, 0, 1, 1], [], []>} : vector<2x1024xbf16>, vector<1024x256xbf16>, vector<2x256xf32> -> vector<2x256xf32>
    %c0_3 = arith.constant 0 : index
    %c0_4 = arith.constant 0 : index
    %4 = vector.load %arg2[%c0_3, %c0_4] : memref<1x256xf32, #tpu.memory_space<vmem>>, vector<1x256xf32>
    %5 = vector.broadcast %4 : vector<1x256xf32> to vector<2x256xf32>
    %6 = arith.addf %3, %5 : vector<2x256xf32>
    %cst_5 = arith.constant 0.000000e+00 : f32
    %7 = vector.broadcast %cst_5 : f32 to vector<2x256xf32>
    %8 = arith.maximumf %6, %7 : vector<2x256xf32>
    %c0_6 = arith.constant 0 : index
    %c0_7 = arith.constant 0 : index
    %9 = vector.load %arg3[%c0_6, %c0_7] : memref<2x256xf32, #tpu.memory_space<vmem>>, vector<2x256xf32>
    tpu.vector_store %arg3[%c0_6, %c0_7], %8 {strides = array<i32>} : memref<2x256xf32, #tpu.memory_space<vmem>>, vector<2x256xf32>,
    return
  }
}

</mosaic_0001>

<bundles_post_ra>
// kernel: fc_block_forward.1
= control target key start
LH: loop header
LB: loop body
LE: loop exit
PB: predicated region body
PF: predicated region fallthrough
CT: control target
= control target key end

     0   :  { %8 = vsyncpa [#allocation3], 0  ;;  %s1394_s12 = smov [#allocation2]   ;;  %s1456_s0 = inlined_call_operand.vmem [shape: f32[2,1024], index: 0, kind: input, shape index: {}]   ;;  %s1457_s1 = inlined_call_operand.hbm [shape: bf16[1024,256], index: 1, kind: input, shape index: {}]   ;;  %s1458_s2 = inlined_call_operand.vmem [shape: f32[1,256], index: 2, kind: input, shape index: {}]   ;;  %s1459_s3 = inlined_call_operand.vmem [shape: f32[2,256], index: 3, kind: output, shape index: {}]  }
   0x1   :  { %s16_s13 = sshll.u32 %s1394_s12, 4  ;;  %s17_s13 = int_to_ptr.vmem [resolvable:$true] %s16_s13 }
   0x2   :  { %s1380_s14 = scalar_lea.vmem %s17_s13, 16384  ;;  %p1385_p1 = scmp.lt.s32.totalorder %s17_s13, %s17_s13 }
   0x3   :  { %p1381_p0 = scmp.ne.s32.totalorder %s17_s13, %s1380_s14  ;;  %p1386_p2 = scmp.lt.s32.totalorder %s1380_s14, %s1380_s14 }
   0x5   :  { %p1387_p3 = por %p1386_p2, %p1385_p1 }
   0x7   :  { %p1388_p4 = pnand %p1387_p3, %p1381_p0 }
   0x9   :  { %1391 = shalt.err (!%p1388_p4)
}
   0xa   :  { %s1395_s15 = smov 128   ;;  %s1396_s16 = smov 8  }
   0xb   :  { %22 = dma.hbm_to_vmem [thread:$0]  %s1457_s1, 16384, %s17_s13, [#allocation3], %s1395_s15, %s1395_s15, %s1396_s16  }
   0xc   :  { %1392 = dma.done.wait [#allocation3], 16384  }
   0xd   :  { %1393 = vsyncadd [#allocation3], 4294950912  ;;  %v1178_v0 = vld [vmem:[#allocation2 + $0x74] ss:$8 sps:$4 sm:$0xff]   ;;  %v1182_v2 = vld [vmem:[#allocation2 + $0x70] ss:$8 sps:$4 sm:$0xff]   ;;  %v36_v38 = vlaneseq }
   0xe   :  { %v1180_v1 = vld [vmem:[#allocation2 + $0x174] ss:$8 sps:$4 sm:$0xff]   ;;  %862 = vmatprep.subr.bf16.mxu0 %v1178_v0  ;;  %v1183_v3 = vld [vmem:[#allocation2 + $0x170] ss:$8 sps:$4 sm:$0xff]   ;;  %v1184_v4 = vld [vmem:[#allocation2 + $0x64] ss:$8 sps:$4 sm:$0xff]  }
   0xf   :  { %903 = vmatprep.subr.bf16.mxu1 %v1180_v1  ;;  %863 = vmatpush1.bf16.msra.mxu0 %v1182_v2  ;;  %v1186_v5 = vld [vmem:[#allocation2 + $0x164] ss:$8 sps:$4 sm:$0xff]   ;;  %v1188_v6 = vld [vmem:[#allocation2 + $0x60] ss:$8 sps:$4 sm:$0xff]   ;;  %v1190_v8 = vld [vmem:[#allocation2 + $0x54] ss:$8 sps:$4 sm:$0xff]  }
  0x10   :  { %904 = vmatpush1.bf16.msra.mxu1 %v1183_v3  ;;  %864 = vmatprep.subr.bf16.mxu0 %v1184_v4  ;;  %v1189_v7 = vld [vmem:[#allocation2 + $0x160] ss:$8 sps:$4 sm:$0xff]   ;;  %v1192_v9 = vld [vmem:[#allocation2 + $0x154] ss:$8 sps:$4 sm:$0xff]   ;;  %v1194_v10 = vld [vmem:[#allocation2 + $0x50] ss:$8 sps:$4 sm:$0xff]  }
  0x11   :  { %905 = vmatprep.subr.bf16.mxu1 %v1186_v5  ;;  %v1195_v11 = vld [vmem:[#allocation2 + $0x150] ss:$8 sps:$4 sm:$0xff]   ;;  %v1196_v12 = vld [vmem:[#allocation2 + $0x44] ss:$8 sps:$4 sm:$0xff]   ;;  %v1200_v14 = vld [vmem:[#allocation2 + $0x40] ss:$8 sps:$4 sm:$0xff]  }
  0x12   :  { %v1198_v13 = vld [vmem:[#allocation2 + $0x144] ss:$8 sps:$4 sm:$0xff]   ;;  %v1201_v15 = vld [vmem:[#allocation2 + $0x140] ss:$8 sps:$4 sm:$0xff]   ;;  %v1202_v16 = vld [vmem:[#allocation2 + $0x34] ss:$8 sps:$4 sm:$0xff]  }
  0x13   :  { %865 = vmatpush1.bf16.msra.mxu0 %v1188_v6  ;;  %v1204_v17 = vld [vmem:[#allocation2 + $0x134] ss:$8 sps:$4 sm:$0xff]   ;;  %v1206_v18 = vld [vmem:[#allocation2 + $0x30] ss:$8 sps:$4 sm:$0xff]   ;;  %v1208_v20 = vld [vmem:[#allocation2 + $0x24] ss:$8 sps:$4 sm:$0xff]  }
  0x14   :  { %906 = vmatpush1.bf16.msra.mxu1 %v1189_v7  ;;  %866 = vmatprep.subr.bf16.mxu0 %v1190_v8  ;;  %v1207_v19 = vld [vmem:[#allocation2 + $0x130] ss:$8 sps:$4 sm:$0xff]   ;;  %v1210_v21 = vld [vmem:[#allocation2 + $0x124] ss:$8 sps:$4 sm:$0xff]   ;;  %v1212_v22 = vld [vmem:[#allocation2 + $0x20] ss:$8 sps:$4 sm:$0xff]  }
  0x15   :  { %907 = vmatprep.subr.bf16.mxu1 %v1192_v9  ;;  %v1213_v23 = vld [vmem:[#allocation2 + $0x120] ss:$8 sps:$4 sm:$0xff]   ;;  %v1214_v24 = vld [vmem:[#allocation2 + $0x14] ss:$8 sps:$4 sm:$0xff]   ;;  %v1218_v26 = vld [vmem:[#allocation2 + $0x10] ss:$8 sps:$4 sm:$0xff]  }
  0x16   :  { %v1216_v25 = vld [vmem:[#allocation2 + $0x114] ss:$8 sps:$4 sm:$0xff]   ;;  %v1219_v27 = vld [vmem:[#allocation2 + $0x110] ss:$8 sps:$4 sm:$0xff]   ;;  %v1220_v28 = vld [vmem:[#allocation2 + $0x4] ss:$8 sps:$4 sm:$0xff]  }
  0x17   :  { %867 = vmatpush1.bf16.msra.mxu0 %v1194_v10  ;;  %v1222_v29 = vld [vmem:[#allocation2 + $0x104] ss:$8 sps:$4 sm:$0xff]   ;;  %v1224_v30 = vld [vmem:[#allocation2] ss:$8 sps:$4 sm:$0xff]   ;;  %v1226_v32 = vld [vmem:[#allocation2 + $0xf4] ss:$8 sps:$4 sm:$0xff]  }
  0x18   :  { %908 = vmatpush1.bf16.msra.mxu1 %v1195_v11  ;;  %868 = vmatprep.subr.bf16.mxu0 %v1196_v12  ;;  %v1225_v31 = vld [vmem:[#allocation2 + $0x100] ss:$8 sps:$4 sm:$0xff]   ;;  %v1228_v33 = vld [vmem:[#allocation2 + $0x1f4] ss:$8 sps:$4 sm:$0xff]   ;;  %v1230_v34 = vld [vmem:[#allocation2 + $0xf0] ss:$8 sps:$4 sm:$0xff]  }
  0x19   :  { %909 = vmatprep.subr.bf16.mxu1 %v1198_v13  ;;  %v1231_v35 = vld [vmem:[#allocation2 + $0x1f0] ss:$8 sps:$4 sm:$0xff]   ;;  %v1397_v36 = vmov 1983009808   ;;  %v1232_v39 = vld [vmem:[#allocation2 + $0xe4] ss:$8 sps:$4 sm:$0xff]  }
  0x1a   :  { %v34_v37 = vunpack.c.l.s4 %v1397_v36  ;;  %v1234_v40 = vld [vmem:[#allocation2 + $0x1e4] ss:$8 sps:$4 sm:$0xff]   ;;  %v1236_v41 = vld [vmem:[#allocation2 + $0xe0] ss:$8 sps:$4 sm:$0xff]   ;;  %v1421_v43 = vshrl.u32 %v36_v38, 7 }
  0x1b   :  { %869 = vmatpush1.bf16.msra.mxu0 %v1200_v14  ;;  %v1237_v44 = vld [vmem:[#allocation2 + $0x1e0] ss:$8 sps:$4 sm:$0xff]   ;;  %v1238_v45 = vld [vmem:[#allocation2 + $0xd4] ss:$8 sps:$4 sm:$0xff]   ;;  %v1242_v47 = vld [vmem:[#allocation2 + $0xd0] ss:$8 sps:$4 sm:$0xff]  }
  0x1c   :  { %910 = vmatpush1.bf16.msra.mxu1 %v1201_v15  ;;  %870 = vmatprep.subr.bf16.mxu0 %v1202_v16  ;;  %v35_v42 = vunpack.c.0.s8 %v34_v37  ;;  %v1240_v46 = vld [vmem:[#allocation2 + $0x1d4] ss:$8 sps:$4 sm:$0xff]   ;;  %v1243_v48 = vld [vmem:[#allocation2 + $0x1d0] ss:$8 sps:$4 sm:$0xff]   ;;  %v1244_v50 = vld [vmem:[#allocation2 + $0xc4] ss:$8 sps:$4 sm:$0xff]  }
  0x1d   :  { %911 = vmatprep.subr.bf16.mxu1 %v1204_v17  ;;  %v1246_v51 = vld [vmem:[#allocation2 + $0x1c4] ss:$8 sps:$4 sm:$0xff]   ;;  %v1248_v53 = vld [vmem:[#allocation2 + $0xc0] ss:$8 sps:$4 sm:$0xff]   ;;  %v1250_v57 = vld [vmem:[#allocation2 + $0xb4] ss:$8 sps:$4 sm:$0xff]  }
  0x1e   :  { %v1424_v49 = vsub.s32 %v35_v42, %v1421_v43  ;;  %v28_v52 = vld [vmem:[%s1456_s0] sm:$0xff]  ;;  %v1252_v58 = vld [vmem:[#allocation2 + $0x1b4] ss:$8 sps:$4 sm:$0xff]   ;;  %v1254_v61 = vld [vmem:[#allocation2 + $0xb0] ss:$8 sps:$4 sm:$0xff]  }
  0x1f   :  { %871 = vmatpush1.bf16.msra.mxu0 %v1206_v18  ;;  %v32_v55 = vcombine.high %v28_v52, %v28_v52  ;;  %v1249_v56 = vld [vmem:[#allocation2 + $0x1c0] ss:$8 sps:$4 sm:$0xff]   ;;  %v1255_v0 = vld [vmem:[#allocation2 + $0x1b0] ss:$8 sps:$4 sm:$0xff]   ;;  %v1256_v1 = vld [vmem:[#allocation2 + $0xa4] ss:$8 sps:$4 sm:$0xff]  }
  0x20   :  { %912 = vmatpush1.bf16.msra.mxu1 %v1207_v19  ;;  %872 = vmatprep.subr.bf16.mxu0 %v1208_v20  ;;  %v39_v54 = vrot.slane %v28_v52, %v1424_v49  ;;  %v1258_v2 = vld [vmem:[#allocation2 + $0x1a4] ss:$8 sps:$4 sm:$0xff]   ;;  %v1260_v4 = vld [vmem:[#allocation2 + $0xa0] ss:$8 sps:$4 sm:$0xff]   ;;  %v1262_v6 = vld [vmem:[#allocation2 + $0x94] ss:$8 sps:$4 sm:$0xff]  }
  0x21   :  { %913 = vmatprep.subr.bf16.mxu1 %v1210_v21  ;;  %v46_v60 = vrot.slane %v32_v55, %v1424_v49  ;;  %v1261_v5 = vld [vmem:[#allocation2 + $0x1a0] ss:$8 sps:$4 sm:$0xff]   ;;  %v1264_v7 = vld [vmem:[#allocation2 + $0x194] ss:$8 sps:$4 sm:$0xff]   ;;  %v1266_v8 = vld [vmem:[#allocation2 + $0x90] ss:$8 sps:$4 sm:$0xff]  }
  0x22   :  { %v47_v59 = vcombine.high %v39_v54, %v39_v54  ;;  %v1267_v9 = vld [vmem:[#allocation2 + $0x190] ss:$8 sps:$4 sm:$0xff]   ;;  %v1268_v10 = vld [vmem:[#allocation2 + $0x84] ss:$8 sps:$4 sm:$0xff]   ;;  %v1272_v12 = vld [vmem:[#allocation2 + $0x80] ss:$8 sps:$4 sm:$0xff]   ;;  %v74_v16 = vpack.c.bf16 %v39_v54, %v39_v54 }
  0x23   :  { %873 = vmatpush1.bf16.msra.mxu0 %v1212_v22  ;;  %v48_v63 = vcombine.high %v46_v60, %v46_v60  ;;  %v1270_v11 = vld [vmem:[#allocation2 + $0x184] ss:$8 sps:$4 sm:$0xff]   ;;  %v1273_v13 = vld [vmem:[#allocation2 + $0x180] ss:$8 sps:$4 sm:$0xff]   ;;  %v1277_v14 = vld [vmem:[#allocation2 + $0x274] ss:$8 sps:$4 sm:$0xff]   ;;  %v76_v17 = vpack.c.bf16 %v46_v60, %v46_v60 }
  0x24   :  { %914 = vmatpush1.bf16.msra.mxu1 %v1213_v23  ;;  %874 = vmatprep.subr.bf16.mxu0 %v1214_v24  ;;  %v75_v62 = vpack.c.bf16 %v47_v59, %v47_v59  ;;  %v1280_v15 = vld [vmem:[#allocation2 + $0x374] ss:$8 sps:$4 sm:$0xff]   ;;  %v1275_v18 = vld [vmem:[#allocation2 + $0x270] ss:$8 sps:$4 sm:$0xff]   ;;  %v1283_v20 = vld [vmem:[#allocation2 + $0x264] ss:$8 sps:$4 sm:$0xff]  }
  0x25   :  { %915 = vmatprep.subr.bf16.mxu1 %v1216_v25  ;;  %v77_v3 = vpack.c.bf16 %v48_v63, %v48_v63  ;;  %v1278_v19 = vld [vmem:[#allocation2 + $0x370] ss:$8 sps:$4 sm:$0xff]   ;;  %v1286_v21 = vld [vmem:[#allocation2 + $0x364] ss:$8 sps:$4 sm:$0xff]   ;;  %v1281_v22 = vld [vmem:[#allocation2 + $0x260] ss:$8 sps:$4 sm:$0xff]  }
  0x26   :  { %894 = vmatprep.mubr.bf16.mxu0 %v75_v62  ;;  %v1284_v23 = vld [vmem:[#allocation2 + $0x360] ss:$8 sps:$4 sm:$0xff]   ;;  %v1289_v24 = vld [vmem:[#allocation2 + $0x254] ss:$8 sps:$4 sm:$0xff]   ;;  %v1307_v36 = vld [vmem:[#allocation2 + $0x224] ss:$8 sps:$4 sm:$0xff]  }
  0x27   :  { %875 = vmatpush1.bf16.msra.mxu0 %v1218_v26  ;;  %935 = vmatprep.mubr.bf16.mxu1 %v77_v3  ;;  %v1292_v25 = vld [vmem:[#allocation2 + $0x354] ss:$8 sps:$4 sm:$0xff]   ;;  %v1287_v26 = vld [vmem:[#allocation2 + $0x250] ss:$8 sps:$4 sm:$0xff]   ;;  %v1310_v37 = vld [vmem:[#allocation2 + $0x324] ss:$8 sps:$4 sm:$0xff]  }
  0x28   :  { %916 = vmatpush1.bf16.msra.mxu1 %v1219_v27  ;;  %876 = vmatprep.subr.bf16.mxu0 %v1220_v28  ;;  %v1290_v27 = vld [vmem:[#allocation2 + $0x350] ss:$8 sps:$4 sm:$0xff]   ;;  %v1295_v28 = vld [vmem:[#allocation2 + $0x244] ss:$8 sps:$4 sm:$0xff]   ;;  %v1305_v38 = vld [vmem:[#allocation2 + $0x220] ss:$8 sps:$4 sm:$0xff]  }
  0x29   :  { %917 = vmatprep.subr.bf16.mxu1 %v1222_v29  ;;  %v1298_v29 = vld [vmem:[#allocation2 + $0x344] ss:$8 sps:$4 sm:$0xff]   ;;  %v1317_v55 = vld [vmem:[#allocation2 + $0x200] ss:$8 sps:$4 sm:$0xff]   ;;  %v1328_v59 = vld [vmem:[#allocation2 + $0x3f4] ss:$8 sps:$4 sm:$0xff]  }
  0x2a   :  { %v29_v42 = vld [vmem:[%s1456_s0 + $0x8] sm:$0xff]  ;;  %v1326_v60 = vld [vmem:[#allocation2 + $0x3f0] ss:$8 sps:$4 sm:$0xff]  }
  0x2b   :  { %877 = vmatpush1.bf16.msra.mxu0 %v1224_v30  ;;  %v1293_v30 = vld [vmem:[#allocation2 + $0x240] ss:$8 sps:$4 sm:$0xff]   ;;  %v1322_v52 = vld [vmem:[#allocation2 + $0x304] ss:$8 sps:$4 sm:$0xff]   ;;  %v1335_v3 = vld [vmem:[#allocation2 + $0x2d0] ss:$8 sps:$4 sm:$0xff]  }
  0x2c   :  { %918 = vmatpush1.bf16.msra.mxu1 %v1225_v31  ;;  %878 = vmatprep.subr.bf16.mxu0 %v1226_v32  ;;  %v1296_v31 = vld [vmem:[#allocation2 + $0x340] ss:$8 sps:$4 sm:$0xff]   ;;  %v1301_v32 = vld [vmem:[#allocation2 + $0x234] ss:$8 sps:$4 sm:$0xff]   ;;  %v1334_v62 = vld [vmem:[#allocation2 + $0x3e4] ss:$8 sps:$4 sm:$0xff]  }
  0x2d   :  { %919 = vmatprep.subr.bf16.mxu1 %v1228_v33  ;;  %v1304_v33 = vld [vmem:[#allocation2 + $0x334] ss:$8 sps:$4 sm:$0xff]   ;;  %v1329_v63 = vld [vmem:[#allocation2 + $0x2e0] ss:$8 sps:$4 sm:$0xff]  }
  0x2f   :  { %879 = vmatpush2.bf16.msra.mxu0 %v1230_v34  ;;  %v1299_v34 = vld [vmem:[#allocation2 + $0x230] ss:$8 sps:$4 sm:$0xff]  }
  0x30   :  { %920 = vmatpush2.bf16.msra.mxu1 %v1231_v35  ;;  %880 = vmatprep.subr.bf16.mxu0 %v1232_v39  ;;  %v1302_v35 = vld [vmem:[#allocation2 + $0x330] ss:$8 sps:$4 sm:$0xff]   ;;  %v1308_v39 = vld [vmem:[#allocation2 + $0x320] ss:$8 sps:$4 sm:$0xff]  }
  0x31   :  { %921 = vmatprep.subr.bf16.mxu1 %v1234_v40  ;;  %v1313_v40 = vld [vmem:[#allocation2 + $0x214] ss:$8 sps:$4 sm:$0xff]  }
  0x33   :  { %881 = vmatpush2.bf16.msra.mxu0 %v1236_v41  ;;  %v1316_v41 = vld [vmem:[#allocation2 + $0x314] ss:$8 sps:$4 sm:$0xff]  }
  0x34   :  { %922 = vmatpush2.bf16.msra.mxu1 %v1237_v44  ;;  %882 = vmatprep.subr.bf16.mxu0 %v1238_v45  ;;  %v1435_v44 = vrot.slane %v29_v42, %v1424_v49  ;;  %v49_v45 = vcombine.high %v29_v42, %v29_v42 }
  0x35   :  { %923 = vmatprep.subr.bf16.mxu1 %v1240_v46  ;;  %v1311_v46 = vld [vmem:[#allocation2 + $0x210] ss:$8 sps:$4 sm:$0xff]  }
  0x37   :  { %883 = vmatpush2.bf16.msra.mxu0 %v1242_v47  ;;  %v1314_v47 = vld [vmem:[#allocation2 + $0x310] ss:$8 sps:$4 sm:$0xff]  }
  0x38   :  { %924 = vmatpush2.bf16.msra.mxu1 %v1243_v48  ;;  %884 = vmatprep.subr.bf16.mxu0 %v1244_v50  ;;  %v64_v48 = vcombine.high %v1435_v44, %v1435_v44  ;;  %v1440_v50 = vrot.slane %v49_v45, %v1424_v49  ;;  %v1323_v49 = vld [vmem:[#allocation2 + $0x2f0] ss:$8 sps:$4 sm:$0xff]  }
  0x39   :  { %925 = vmatprep.subr.bf16.mxu1 %v1246_v51  ;;  %v1319_v51 = vld [vmem:[#allocation2 + $0x204] ss:$8 sps:$4 sm:$0xff]  }
  0x3a   :  { %v65_v54 = vcombine.high %v1440_v50, %v1440_v50 }
  0x3b   :  { %885 = vmatpush2.bf16.msra.mxu0 %v1248_v53  ;;  %v79_v53 = vpack.c.bf16 %v64_v48, %v64_v48 }
  0x3c   :  { %926 = vmatpush2.bf16.msra.mxu1 %v1249_v56  ;;  %886 = vmatprep.subr.bf16.mxu0 %v1250_v57  ;;  %v1320_v56 = vld [vmem:[#allocation2 + $0x300] ss:$8 sps:$4 sm:$0xff]   ;;  %v81_v57 = vpack.c.bf16 %v65_v54, %v65_v54 }
  0x3d   :  { %927 = vmatprep.subr.bf16.mxu1 %v1252_v58  ;;  %v1325_v58 = vld [vmem:[#allocation2 + $0x2f4] ss:$8 sps:$4 sm:$0xff]  }
  0x3f   :  { %887 = vmatpush2.bf16.msra.mxu0 %v1254_v61  ;;  %v1331_v61 = vld [vmem:[#allocation2 + $0x2e4] ss:$8 sps:$4 sm:$0xff]  }
  0x40   :  { %928 = vmatpush2.bf16.msra.mxu1 %v1255_v0  ;;  %888 = vmatprep.subr.bf16.mxu0 %v1256_v1  ;;  %v1332_v0 = vld [vmem:[#allocation2 + $0x3e0] ss:$8 sps:$4 sm:$0xff]   ;;  %v1337_v1 = vld [vmem:[#allocation2 + $0x2d4] ss:$8 sps:$4 sm:$0xff]  }
  0x41   :  { %929 = vmatprep.subr.bf16.mxu1 %v1258_v2  ;;  %v1340_v2 = vld [vmem:[#allocation2 + $0x3d4] ss:$8 sps:$4 sm:$0xff]  }
  0x43   :  { %889 = vmatpush2.bf16.msra.mxu0 %v1260_v4  ;;  %v1338_v4 = vld [vmem:[#allocation2 + $0x3d0] ss:$8 sps:$4 sm:$0xff]  }
  0x44   :  { %930 = vmatpush2.bf16.msra.mxu1 %v1261_v5  ;;  %890 = vmatprep.subr.bf16.mxu0 %v1262_v6  ;;  %v1343_v5 = vld [vmem:[#allocation2 + $0x2c4] ss:$8 sps:$4 sm:$0xff]  }
  0x45   :  { %931 = vmatprep.subr.bf16.mxu1 %v1264_v7  ;;  %v1346_v6 = vld [vmem:[#allocation2 + $0x3c4] ss:$8 sps:$4 sm:$0xff]   ;;  %v1341_v7 = vld [vmem:[#allocation2 + $0x2c0] ss:$8 sps:$4 sm:$0xff]  }
  0x47   :  { %891 = vmatpush2.bf16.msra.mxu0 %v1266_v8  ;;  %v1344_v8 = vld [vmem:[#allocation2 + $0x3c0] ss:$8 sps:$4 sm:$0xff]  }
  0x48   :  { %932 = vmatpush2.bf16.msra.mxu1 %v1267_v9  ;;  %892 = vmatprep.subr.bf16.mxu0 %v1268_v10  ;;  %v1349_v9 = vld [vmem:[#allocation2 + $0x2b4] ss:$8 sps:$4 sm:$0xff]  }
  0x49   :  { %933 = vmatprep.subr.bf16.mxu1 %v1270_v11  ;;  %v1352_v10 = vld [vmem:[#allocation2 + $0x3b4] ss:$8 sps:$4 sm:$0xff]   ;;  %v1347_v11 = vld [vmem:[#allocation2 + $0x2b0] ss:$8 sps:$4 sm:$0xff]  }
  0x4b   :  { %893 = vmatpush2.bf16.msra.mxu0 %v1272_v12  ;;  %v1350_v12 = vld [vmem:[#allocation2 + $0x3b0] ss:$8 sps:$4 sm:$0xff]  }
  0x4c   :  { %934 = vmatpush2.bf16.msra.mxu1 %v1273_v13  ;;  %944 = vmatprep.subr.bf16.mxu0 %v1277_v14  ;;  %v1355_v13 = vld [vmem:[#allocation2 + $0x2a4] ss:$8 sps:$4 sm:$0xff]  }
  0x4d   :  { %985 = vmatprep.subr.bf16.mxu1 %v1280_v15  ;;  %v1358_v14 = vld [vmem:[#allocation2 + $0x3a4] ss:$8 sps:$4 sm:$0xff]   ;;  %v1353_v15 = vld [vmem:[#allocation2 + $0x2a0] ss:$8 sps:$4 sm:$0xff]  }
  0x4e   :  { %895 = vmatmul.mubr.bf16.vlgmr.msra.gmra.mxu0 %v74_v16  ;;  %v1356_v16 = vld [vmem:[#allocation2 + $0x3a0] ss:$8 sps:$4 sm:$0xff]  }
  0x4f   :  { %936 = vmatmul.mubr.bf16.vlgmr.msra.gmra.mxu1 %v76_v17  ;;  %945 = vmatpush1.bf16.msra.mxu0 %v1275_v18  ;;  %v1361_v17 = vld [vmem:[#allocation2 + $0x294] ss:$8 sps:$4 sm:$0xff]  }
  0x50   :  { %986 = vmatpush1.bf16.msra.mxu1 %v1278_v19  ;;  %946 = vmatprep.subr.bf16.mxu0 %v1283_v20  ;;  %v1364_v18 = vld [vmem:[#allocation2 + $0x394] ss:$8 sps:$4 sm:$0xff]   ;;  %v1359_v19 = vld [vmem:[#allocation2 + $0x290] ss:$8 sps:$4 sm:$0xff]  }
  0x51   :  { %987 = vmatprep.subr.bf16.mxu1 %v1286_v21  ;;  %976 = vmatprep.mubr.bf16.mxu0 %v79_v53  ;;  %v1362_v20 = vld [vmem:[#allocation2 + $0x390] ss:$8 sps:$4 sm:$0xff]   ;;  %v1367_v21 = vld [vmem:[#allocation2 + $0x284] ss:$8 sps:$4 sm:$0xff]  }
  0x52   :  { %1017 = vmatprep.mubr.bf16.mxu1 %v81_v57 }
  0x53   :  { %947 = vmatpush1.bf16.msra.mxu0 %v1281_v22  ;;  %v1370_v22 = vld [vmem:[#allocation2 + $0x384] ss:$8 sps:$4 sm:$0xff]  }
  0x54   :  { %988 = vmatpush1.bf16.msra.mxu1 %v1284_v23  ;;  %948 = vmatprep.subr.bf16.mxu0 %v1289_v24  ;;  %v1365_v23 = vld [vmem:[#allocation2 + $0x280] ss:$8 sps:$4 sm:$0xff]  }
  0x55   :  { %989 = vmatprep.subr.bf16.mxu1 %v1292_v25  ;;  %v1368_v24 = vld [vmem:[#allocation2 + $0x380] ss:$8 sps:$4 sm:$0xff]   ;;  %v78_v25 = vpack.c.bf16 %v1435_v44, %v1435_v44 }
  0x57   :  { %949 = vmatpush1.bf16.msra.mxu0 %v1287_v26  ;;  %v80_v26 = vpack.c.bf16 %v1440_v50, %v1440_v50 }
  0x58   :  { %990 = vmatpush1.bf16.msra.mxu1 %v1290_v27  ;;  %950 = vmatprep.subr.bf16.mxu0 %v1295_v28 }
  0x59   :  { %991 = vmatprep.subr.bf16.mxu1 %v1298_v29 }
  0x5b   :  { %951 = vmatpush1.bf16.msra.mxu0 %v1293_v30 }
  0x5c   :  { %992 = vmatpush1.bf16.msra.mxu1 %v1296_v31  ;;  %952 = vmatprep.subr.bf16.mxu0 %v1301_v32 }
  0x5d   :  { %993 = vmatprep.subr.bf16.mxu1 %v1304_v33 }
  0x5f   :  { %953 = vmatpush1.bf16.msra.mxu0 %v1299_v34 }
  0x60   :  { %994 = vmatpush1.bf16.msra.mxu1 %v1302_v35  ;;  %954 = vmatprep.subr.bf16.mxu0 %v1307_v36  ;;  %v214_v35 = vsub.s32 0, %v1421_v43  ;;  %v210_v36 = vld [vmem:[%s1458_s2] sm:$0x3] }
  0x61   :  { %995 = vmatprep.subr.bf16.mxu1 %v1310_v37  ;;  %v218_v37 = vsub.s32 1, %v1421_v43 }
  0x63   :  { %955 = vmatpush1.bf16.msra.mxu0 %v1305_v38  ;;  %v215_v38 = vrot.slane %v210_v36, %v214_v35 }
  0x64   :  { %996 = vmatpush1.bf16.msra.mxu1 %v1308_v39  ;;  %956 = vmatprep.subr.bf16.mxu0 %v1313_v40  ;;  %v219_v39 = vrot.slane %v210_v36, %v218_v37 }
  0x65   :  { %997 = vmatprep.subr.bf16.mxu1 %v1316_v41 }
  0x67   :  { %957 = vmatpush1.bf16.msra.mxu0 %v1311_v46 }
  0x68   :  { %998 = vmatpush1.bf16.msra.mxu1 %v1314_v47  ;;  %958 = vmatprep.subr.bf16.mxu0 %v1319_v51 }
  0x69   :  { %999 = vmatprep.subr.bf16.mxu1 %v1322_v52 }
  0x6b   :  { %959 = vmatpush1.bf16.msra.mxu0 %v1317_v55 }
  0x6c   :  { %1000 = vmatpush1.bf16.msra.mxu1 %v1320_v56  ;;  %960 = vmatprep.subr.bf16.mxu0 %v1325_v58 }
  0x6d   :  { %1001 = vmatprep.subr.bf16.mxu1 %v1328_v59 }
  0x6f   :  { %961 = vmatpush2.bf16.msra.mxu0 %v1323_v49 }
  0x70   :  { %1002 = vmatpush2.bf16.msra.mxu1 %v1326_v60  ;;  %962 = vmatprep.subr.bf16.mxu0 %v1331_v61 }
  0x71   :  { %1003 = vmatprep.subr.bf16.mxu1 %v1334_v62 }
  0x73   :  { %963 = vmatpush2.bf16.msra.mxu0 %v1329_v63 }
  0x74   :  { %1004 = vmatpush2.bf16.msra.mxu1 %v1332_v0  ;;  %964 = vmatprep.subr.bf16.mxu0 %v1337_v1 }
  0x75   :  { %1005 = vmatprep.subr.bf16.mxu1 %v1340_v2 }
  0x77   :  { %965 = vmatpush2.bf16.msra.mxu0 %v1335_v3 }
  0x78   :  { %1006 = vmatpush2.bf16.msra.mxu1 %v1338_v4  ;;  %966 = vmatprep.subr.bf16.mxu0 %v1343_v5 }
  0x79   :  { %1007 = vmatprep.subr.bf16.mxu1 %v1346_v6 }
  0x7b   :  { %967 = vmatpush2.bf16.msra.mxu0 %v1341_v7 }
  0x7c   :  { %1008 = vmatpush2.bf16.msra.mxu1 %v1344_v8  ;;  %968 = vmatprep.subr.bf16.mxu0 %v1349_v9 }
  0x7d   :  { %1009 = vmatprep.subr.bf16.mxu1 %v1352_v10 }
  0x7f   :  { %969 = vmatpush2.bf16.msra.mxu0 %v1347_v11 }
  0x80   :  { %1010 = vmatpush2.bf16.msra.mxu1 %v1350_v12  ;;  %970 = vmatprep.subr.bf16.mxu0 %v1355_v13 }
  0x81   :  { %1011 = vmatprep.subr.bf16.mxu1 %v1358_v14 }
  0x83   :  { %971 = vmatpush2.bf16.msra.mxu0 %v1353_v15 }
  0x84   :  { %1012 = vmatpush2.bf16.msra.mxu1 %v1356_v16  ;;  %972 = vmatprep.subr.bf16.mxu0 %v1361_v17 }
  0x85   :  { %1013 = vmatprep.subr.bf16.mxu1 %v1364_v18 }
  0x87   :  { %973 = vmatpush2.bf16.msra.mxu0 %v1359_v19 }
  0x88   :  { %1014 = vmatpush2.bf16.msra.mxu1 %v1362_v20  ;;  %974 = vmatprep.subr.bf16.mxu0 %v1367_v21 }
  0x89   :  { %1015 = vmatprep.subr.bf16.mxu1 %v1370_v22 }
  0x8b   :  { %975 = vmatpush2.bf16.msra.mxu0 %v1365_v23 }
  0x8c   :  { %1016 = vmatpush2.bf16.msra.mxu1 %v1368_v24 }
  0x8e   :  { %977 = vmatmul.mubr.bf16.vlgmr.msra.gmra.mxu0 %v78_v25 }
  0x8f   :  { %1018 = vmatmul.mubr.bf16.vlgmr.msra.gmra.mxu1 %v80_v26 }
 0x10e   :  { %v896_v27 = vpop.f32.mrf.mxu0 }
 0x10f   :  { %v937_v28 = vpop.f32.mrf.mxu1  ;;  %v897_v40 = vadd.f32 %v896_v27, %v215_v38 }
 0x110   :  { %v898_v29 = vpop.f32.mrf.mxu0 }
 0x111   :  { %v939_v30 = vpop.f32.mrf.mxu1  ;;  %v899_v41 = vadd.f32 %v898_v29, %v219_v39  ;;  %v938_v42 = vadd.f32 %v937_v28, %v897_v40 }
 0x112   :  { %v900_v31 = vpop.f32.mrf.mxu0 }
 0x113   :  { %v941_v32 = vpop.f32.mrf.mxu1  ;;  %v940_v46 = vadd.f32 %v939_v30, %v899_v41 }
 0x114   :  { %v901_v33 = vpop.f32.mrf.mxu0 }
 0x115   :  { %v942_v34 = vpop.f32.mrf.mxu1 }
 0x14e   :  { %v978_v44 = vpop.f32.mrf.mxu0 }
 0x14f   :  { %v1019_v45 = vpop.f32.mrf.mxu1  ;;  %v979_v47 = vadd.f32 %v978_v44, %v938_v42 }
 0x150   :  { %v980_v48 = vpop.f32.mrf.mxu0 }
 0x151   :  { %v1021_v50 = vpop.f32.mrf.mxu1  ;;  %v1020_v51 = vadd.f32 %v1019_v45, %v979_v47  ;;  %v981_v52 = vadd.f32 %v980_v48, %v940_v46 }
 0x152   :  { %v982_v53 = vpop.f32.mrf.mxu0 }
 0x153   :  { %v1023_v54 = vpop.f32.mrf.mxu1  ;;  %v1022_v55 = vadd.f32 %v1021_v50, %v981_v52  ;;  %v1026_v58 = vmax.f32 %v1020_v51, 0.0 }
 0x154   :  { %v983_v56 = vpop.f32.mrf.mxu0 }
 0x155   :  { %v1024_v57 = vpop.f32.mrf.mxu1  ;;  %v1027_v43 = vmax.f32 %v1022_v55, 0.0 }
 0x157   :  { %v1030_v59 = vcombine.low %v1026_v58, %v1027_v43 }
 0x159   :  { %1173 = vst.sshfl [vmem:[%s1459_s3] sm:$0x33 pattern:$0x76325410] %v1030_v59 }
 0x15a   :  { %1044 = vsyncpa [#allocation3], 1 }

</bundles_post_ra>
